<compile_context>
chip_gen: v5e
topology: v5e:2x2
jax: 0.10.0
libtpu: 0.0.40
codegen_flags: <defaults>
</compile_context>

<pallas_src>
import jax
import jax.numpy as jnp
from jax.experimental import pallas as pl
from jax.experimental.pallas import tpu as pltpu


def _critic_kernel(x_ref, w1_ref, b1_ref, w2_ref, b2_ref, w3_ref, b3_ref, o_ref):
    p = pl.program_id(0)                       # particle index

    xt = x_ref[...]                            # (Din, TB) — batch on lanes

    # Layer 1: h1ᵀ = tanh(W1 · xᵀ + b1)   (MXU, f32 accumulate; tanh on EUP)
    h1 = jnp.tanh(
        jnp.dot(w1_ref[...], xt, preferred_element_type=jnp.float32)
        + b1_ref[...]                          # (H, 1) broadcast over lanes
    )
    # Layer 2: h2ᵀ = tanh(W2 · h1ᵀ + b2)
    h1c = h1.astype(w2_ref.dtype)              # no-op for f32; bf16 MXU path otherwise
    h2 = jnp.tanh(
        jnp.dot(w2_ref[...], h1c, preferred_element_type=jnp.float32)
        + b2_ref[...]
    )
    # Layer 3 (N=1): VPU multiply by the w3 column + XLU sublane reduction,
    # instead of a degenerate 1-result-row MXU matmul.  b3 scalar from SMEM.
    v = jnp.sum(h2 * w3_ref[...], axis=0, keepdims=True) + b3_ref[p]   # (1, TB)
    o_ref[...] = v.astype(o_ref.dtype)         # lane-dense store


def _round_up(n, m):
    return ((n + m - 1) // m) * m


def svpg_particle_critic_forward(x, params, *, tile_b=2048,
                                 compute_dtype=jnp.float32):
    """3-layer critic MLP for all SVPG particles in one Pallas kernel.

    x:      (P, B, input_dim) or (B, input_dim) (single-critic path, matching
            the original torch module's forward).
    params: dict with particle-stacked tensors in PyTorch (out, in) layout:
              w1 (P, H, Din), b1 (P, H, 1),
              w2 (P, H, H),   b2 (P, H, 1),
              w3 (P, H, 1)    -- layer-3 weight stored as a column,
              b3 (P,)         -- layer-3 bias, float32, kept in SMEM.
    returns (P, B, 1) float32 (or (B, 1) for 2-D input).
    """
    single = (x.ndim == 2)
    if single:
        x = x[None]

    P, B, Din = x.shape
    w1, b1 = params["w1"], params["b1"]
    w2, b2 = params["w2"], params["b2"]
    w3, b3 = params["w3"], params["b3"]
    H = w1.shape[1]
    assert w1.shape == (P, H, Din) and w2.shape == (P, H, H)
    assert b1.shape == (P, H, 1) and b2.shape == (P, H, 1)
    assert w3.shape == (P, H, 1) and b3.shape == (P,)

    # Single compute dtype for x and weights (f32 default = exact reference).
    x = x.astype(compute_dtype)
    w1 = w1.astype(compute_dtype)
    b1 = b1.astype(compute_dtype)
    w2 = w2.astype(compute_dtype)
    b2 = b2.astype(compute_dtype)
    w3 = w3.astype(compute_dtype)
    b3 = b3.astype(jnp.float32)                # SMEM scalar table stays f32

    # Feature-major slab: (P, Din, B) so the batch dim lands on lanes.
    xt = jnp.swapaxes(x, 1, 2)

    # Batch tile: multiple of 128 lanes; default 2048, clamped for small B.
    tb = min(_round_up(tile_b, 128), _round_up(B, 128))
    b_pad = _round_up(B, tb)
    if b_pad != B:
        xt = jnp.pad(xt, ((0, 0), (0, 0), (0, b_pad - B)))
    num_tiles = b_pad // tb

    sq = pl.Squeezed()
    out = pl.pallas_call(
        _critic_kernel,
        out_shape=jax.ShapeDtypeStruct((P, 1, b_pad), jnp.float32),
        grid=(P, num_tiles),  # inner loop over batch tiles -> weights fetched once per particle
        in_specs=[
            pl.BlockSpec((sq, Din, tb), lambda p, i: (p, 0, i)),   # xᵀ tile (lane-dense)
            pl.BlockSpec((sq, H, Din), lambda p, i: (p, 0, 0)),    # W1 (VMEM-resident per particle)
            pl.BlockSpec((sq, H, 1), lambda p, i: (p, 0, 0)),      # b1 column
            pl.BlockSpec((sq, H, H), lambda p, i: (p, 0, 0)),      # W2
            pl.BlockSpec((sq, H, 1), lambda p, i: (p, 0, 0)),      # b2 column
            pl.BlockSpec((sq, H, 1), lambda p, i: (p, 0, 0)),      # w3 column
            pl.BlockSpec(memory_space=pltpu.MemorySpace.SMEM),     # b3 scalar table (P,)
        ],
        out_specs=pl.BlockSpec((sq, 1, tb), lambda p, i: (p, 0, i)),
        compiler_params=pltpu.CompilerParams(
            dimension_semantics=("parallel", "arbitrary"),
            vmem_limit_bytes=32 * 1024 * 1024,
        ),
    )(xt, w1, b1, w2, b2, w3, b3)

    out = out[:, 0, :B][..., None]             # (P, B, 1)
    if single:
        out = out[0]
    return out


def init_svpg_critic_params(key, num_particles, input_dim, hidden_dim):
    """Per-particle init matching torch.nn.Linear defaults:
    U(-1/sqrt(fan_in), 1/sqrt(fan_in)) for weights and biases.
    Weights are kept in PyTorch (out, in) layout."""

    def one(k):
        ks = jax.random.split(k, 6)

        def lin(kw, kb, fan_in, fan_out):
            bound = 1.0 / jnp.sqrt(jnp.float32(fan_in))
            w = jax.random.uniform(kw, (fan_out, fan_in), jnp.float32, -bound, bound)
            b = jax.random.uniform(kb, (fan_out,), jnp.float32, -bound, bound)
            return w, b

        w1, b1 = lin(ks[0], ks[1], input_dim, hidden_dim)
        w2, b2 = lin(ks[2], ks[3], hidden_dim, hidden_dim)
        w3, b3 = lin(ks[4], ks[5], hidden_dim, 1)
        return {
            "w1": w1, "b1": b1[:, None],       # (H, Din), (H, 1)
            "w2": w2, "b2": b2[:, None],       # (H, H),  (H, 1)
            "w3": w3[0][:, None],              # (H, 1) column
            "b3": b3[0],                       # scalar
        }

    keys = jax.random.split(key, num_particles)
    return jax.vmap(one)(keys)                 # leading particle dim on every leaf


def _reference_forward(x, params):
    # x: (P, B, Din); pure-JAX reference of the torch Sequential (batch-major).
    b1 = params["b1"][..., 0][:, None, :]      # (P, 1, H)
    b2 = params["b2"][..., 0][:, None, :]
    h1 = jnp.tanh(jnp.einsum("pbi,phi->pbh", x, params["w1"]) + b1)
    h2 = jnp.tanh(jnp.einsum("pbh,pkh->pbk", h1, params["w2"]) + b2)
    out = jnp.einsum("pbh,ph->pb", h2, params["w3"][..., 0]) + params["b3"][:, None]
    return out[..., None]                      # (P, B, 1)


if __name__ == "__main__":
    key = jax.random.PRNGKey(0)
    k_x, k_p, k_x2 = jax.random.split(key, 3)

    num_particles, batch, input_dim, hidden_dim = 4, 64, 16, 32

    # Particle-batched path: (P, B, input_dim) -> (P, B, 1)
    x = jax.random.normal(k_x, (num_particles, batch, input_dim), jnp.float32)
    params = init_svpg_critic_params(k_p, num_particles, input_dim, hidden_dim)

    out = jax.block_until_ready(svpg_particle_critic_forward(x, params))
    ref = _reference_forward(x, params)
    assert out.shape == (num_particles, batch, 1), out.shape
    assert jnp.allclose(out, ref, atol=1e-5, rtol=1e-5)

    # Single-critic 2-D path (matches the torch module's forward), with a batch
    # that is not a multiple of the tile to exercise the padding/slicing.
    params1 = jax.tree_util.tree_map(lambda a: a[:1], params)
    x1 = jax.random.normal(k_x2, (10, input_dim), jnp.float32)
    out1 = jax.block_until_ready(svpg_particle_critic_forward(x1, params1))
    ref1 = _reference_forward(x1[None], params1)[0]
    assert out1.shape == (10, 1), out1.shape
    assert jnp.allclose(out1, ref1, atol=1e-5, rtol=1e-5)

    print("KERNEL_OK")
</pallas_src>

<mosaic_0001>
module attributes {stable_mosaic.version = 11 : i64} {
  func.func @_critic_kernel(%arg0: i32, %arg1: i32, %arg2: memref<1x16x128xf32, #tpu.memory_space<vmem>>, %arg3: memref<1x32x16xf32, #tpu.memory_space<vmem>>, %arg4: memref<1x32x1xf32, #tpu.memory_space<vmem>>, %arg5: memref<1x32x32xf32, #tpu.memory_space<vmem>>, %arg6: memref<1x32x1xf32, #tpu.memory_space<vmem>>, %arg7: memref<1x32x1xf32, #tpu.memory_space<vmem>>, %arg8: memref<4xf32, #tpu.memory_space<smem>>, %arg9: memref<1x1x128xf32, #tpu.memory_space<vmem>>) attributes {dimension_semantics = [#tpu.dimension_semantics<parallel>, #tpu.dimension_semantics<arbitrary>], iteration_bounds = array<i64: 4, 1>, scalar_prefetch = 0 : i64, scratch_operands = 0 : i64, tpu.core_type = #tpu.core_type<tc>, window_params = [{transform_indices = @transform_0, window_bounds = array<i64: 1, 16, 128>}, {transform_indices = @transform_1, window_bounds = array<i64: 1, 32, 16>}, {transform_indices = @transform_2, window_bounds = array<i64: 1, 32, 1>}, {transform_indices = @transform_3, window_bounds = array<i64: 1, 32, 32>}, {transform_indices = @transform_4, window_bounds = array<i64: 1, 32, 1>}, {transform_indices = @transform_5, window_bounds = array<i64: 1, 32, 1>}, {transform_indices = @transform_6, window_bounds = array<i64: 4>}, {transform_indices = @transform_7, window_bounds = array<i64: 1, 1, 128>}]} {
    %c0 = arith.constant 0 : index
    %c0_0 = arith.constant 0 : index
    %c0_1 = arith.constant 0 : index
    %0 = vector.load %arg2[%c0, %c0_0, %c0_1] : memref<1x16x128xf32, #tpu.memory_space<vmem>>, vector<1x16x128xf32>
    %1 = vector.shape_cast %0 : vector<1x16x128xf32> to vector<16x128xf32>
    %c0_2 = arith.constant 0 : index
    %c0_3 = arith.constant 0 : index
    %c0_4 = arith.constant 0 : index
    %2 = vector.load %arg3[%c0_2, %c0_3, %c0_4] : memref<1x32x16xf32, #tpu.memory_space<vmem>>, vector<1x32x16xf32>
    %3 = vector.shape_cast %2 : vector<1x32x16xf32> to vector<32x16xf32>
    %cst = arith.constant dense<0.000000e+00> : vector<32x128xf32>
    %4 = tpu.matmul %3, %1, %cst {dimension_numbers = #tpu.dot_dimension_numbers<[1], [0], [0], [1], [0, 0, 1, 1], [], []>} : vector<32x16xf32>, vector<16x128xf32>, vector<32x128xf32> -> vector<32x128xf32>
    %c0_5 = arith.constant 0 : index
    %c0_6 = arith.constant 0 : index
    %c0_7 = arith.constant 0 : index
    %5 = vector.load %arg4[%c0_5, %c0_6, %c0_7] : memref<1x32x1xf32, #tpu.memory_space<vmem>>, vector<1x32x1xf32>
    %6 = vector.shape_cast %5 : vector<1x32x1xf32> to vector<32x1xf32>
    %7 = vector.broadcast %6 : vector<32x1xf32> to vector<32x128xf32>
    %8 = arith.addf %4, %7 : vector<32x128xf32>
    %9 = math.tanh %8 : vector<32x128xf32>
    %c0_8 = arith.constant 0 : index
    %c0_9 = arith.constant 0 : index
    %c0_10 = arith.constant 0 : index
    %10 = vector.load %arg5[%c0_8, %c0_9, %c0_10] : memref<1x32x32xf32, #tpu.memory_space<vmem>>, vector<1x32x32xf32>
    %11 = vector.shape_cast %10 : vector<1x32x32xf32> to vector<32x32xf32>
    %cst_11 = arith.constant dense<0.000000e+00> : vector<32x128xf32>
    %12 = tpu.matmul %11, %9, %cst_11 {dimension_numbers = #tpu.dot_dimension_numbers<[1], [0], [0], [1], [0, 0, 1, 1], [], []>} : vector<32x32xf32>, vector<32x128xf32>, vector<32x128xf32> -> vector<32x128xf32>
    %c0_12 = arith.constant 0 : index
    %c0_13 = arith.constant 0 : index
    %c0_14 = arith.constant 0 : index
    %13 = vector.load %arg6[%c0_12, %c0_13, %c0_14] : memref<1x32x1xf32, #tpu.memory_space<vmem>>, vector<1x32x1xf32>
    %14 = vector.shape_cast %13 : vector<1x32x1xf32> to vector<32x1xf32>
    %15 = vector.broadcast %14 : vector<32x1xf32> to vector<32x128xf32>
    %16 = arith.addf %12, %15 : vector<32x128xf32>
    %17 = math.tanh %16 : vector<32x128xf32>
    %c0_15 = arith.constant 0 : index
    %c0_16 = arith.constant 0 : index
    %c0_17 = arith.constant 0 : index
    %18 = vector.load %arg7[%c0_15, %c0_16, %c0_17] : memref<1x32x1xf32, #tpu.memory_space<vmem>>, vector<1x32x1xf32>
    %19 = vector.shape_cast %18 : vector<1x32x1xf32> to vector<32x1xf32>
    %20 = vector.broadcast %19 : vector<32x1xf32> to vector<32x128xf32>
    %21 = arith.mulf %17, %20 : vector<32x128xf32>
    %cst_18 = arith.constant dense<0.000000e+00> : vector<128xf32>
    %22 = vector.multi_reduction <add>, %21, %cst_18 [0] : vector<32x128xf32> to vector<128xf32>
    %23 = vector.shape_cast %22 : vector<128xf32> to vector<1x128xf32>
    %24 = arith.index_cast %arg0 : i32 to index
    %25 = memref.load %arg8[%24] : memref<4xf32, #tpu.memory_space<smem>>
    %26 = vector.broadcast %25 : f32 to vector<1x128xf32>
    %27 = arith.addf %23, %26 : vector<1x128xf32>
    %c0_19 = arith.constant 0 : index
    %c0_20 = arith.constant 0 : index
    %c0_21 = arith.constant 0 : index
    %28 = vector.load %arg9[%c0_19, %c0_20, %c0_21] : memref<1x1x128xf32, #tpu.memory_space<vmem>>, vector<1x1x128xf32>
    %29 = vector.shape_cast %28 : vector<1x1x128xf32> to vector<1x128xf32>
    %30 = vector.shape_cast %27 : vector<1x128xf32> to vector<1x1x128xf32>
    tpu.vector_store %arg9[%c0_19, %c0_20, %c0_21], %30 {strides = array<i32>} : memref<1x1x128xf32, #tpu.memory_space<vmem>>, vector<1x1x128xf32>,
    return
  }
  func.func @transform_0(%arg0: i32, %arg1: i32) -> (i32, i32, i32) {
    %c0_i32 = arith.constant 0 : i32
    %c0_i32_0 = arith.constant 0 : i32
    return %arg0, %c0_i32, %arg1 : i32, i32, i32
  }
  func.func @transform_1(%arg0: i32, %arg1: i32) -> (i32, i32, i32) {
    %c0_i32 = arith.constant 0 : i32
    %c0_i32_0 = arith.constant 0 : i32
    %c0_i32_1 = arith.constant 0 : i32
    return %arg0, %c0_i32, %c0_i32_0 : i32, i32, i32
  }
  func.func @transform_2(%arg0: i32, %arg1: i32) -> (i32, i32, i32) {
    %c0_i32 = arith.constant 0 : i32
    %c0_i32_0 = arith.constant 0 : i32
    %c0_i32_1 = arith.constant 0 : i32
    return %arg0, %c0_i32, %c0_i32_0 : i32, i32, i32
  }
  func.func @transform_3(%arg0: i32, %arg1: i32) -> (i32, i32, i32) {
    %c0_i32 = arith.constant 0 : i32
    %c0_i32_0 = arith.constant 0 : i32
    %c0_i32_1 = arith.constant 0 : i32
    return %arg0, %c0_i32, %c0_i32_0 : i32, i32, i32
  }
  func.func @transform_4(%arg0: i32, %arg1: i32) -> (i32, i32, i32) {
    %c0_i32 = arith.constant 0 : i32
    %c0_i32_0 = arith.constant 0 : i32
    %c0_i32_1 = arith.constant 0 : i32
    return %arg0, %c0_i32, %c0_i32_0 : i32, i32, i32
  }
  func.func @transform_5(%arg0: i32, %arg1: i32) -> (i32, i32, i32) {
    %c0_i32 = arith.constant 0 : i32
    %c0_i32_0 = arith.constant 0 : i32
    %c0_i32_1 = arith.constant 0 : i32
    return %arg0, %c0_i32, %c0_i32_0 : i32, i32, i32
  }
  func.func @transform_6(%arg0: i32, %arg1: i32) -> i32 {
    %c0_i32 = arith.constant 0 : i32
    %c0_i32_0 = arith.constant 0 : i32
    return %c0_i32 : i32
  }
  func.func @transform_7(%arg0: i32, %arg1: i32) -> (i32, i32, i32) {
    %c0_i32 = arith.constant 0 : i32
    %c0_i32_0 = arith.constant 0 : i32
    return %arg0, %c0_i32, %arg1 : i32, i32, i32
  }
}

</mosaic_0001>

<bundles_post_ra>
// kernel: tpu_custom_call.1
= control target key start
LH: loop header
LB: loop body
LE: loop exit
PB: predicated region body
PF: predicated region fallthrough
CT: control target
= control target key end

     0   :  { %12 = vsyncpa [#allocation4], 0  ;;  %s1163_s0 = inlined_call_operand.vmem [shape: f32[4,16,128], index: 0, kind: input, shape index: {}]   ;;  %s1164_s1 = inlined_call_operand.vmem [shape: f32[4,32,16], index: 1, kind: input, shape index: {}]   ;;  %s1165_s2 = inlined_call_operand.vmem [shape: f32[4,32,1], index: 2, kind: input, shape index: {}]   ;;  %s1166_s3 = inlined_call_operand.vmem [shape: f32[4,32,32], index: 3, kind: input, shape index: {}]   ;;  %s1167_s4 = inlined_call_operand.vmem [shape: f32[4,32,1], index: 4, kind: input, shape index: {}]   ;;  %s1168_s5 = inlined_call_operand.vmem [shape: f32[4,32,1], index: 5, kind: input, shape index: {}]   ;;  %s1169_s6 = inlined_call_operand.vmem [shape: f32[4], index: 6, kind: input, shape index: {}]   ;;  %s1170_s7 = inlined_call_operand.hbm [shape: f32[4,1,128], index: 7, kind: output, shape index: {}]  }
   0x1   :  { %13 = vsyncpa [#allocation3], 0 }
   0x2   :  { %15 = vsyncpa [#allocation3 + $0x1], 0  ;;  %s1030_s24 = smov 0   ;;  %s1032_s25 = smov 0  }
   0x3   :  { %s1034_s26 = smov 0   ;;  %s1036_s27 = smov 0  }
   0x4   :  { %s1038_s28 = smov 0   ;;  %s1040_s29 = smov 0  }
   0x5 LB: > { %s762_s30 = sadd.s32 4294967295, %s986_s29   ;;  %s763_s8 = sadd.s32 4294967294, %s986_s29   ;;  %s986_s29 = sphi %s1040_s29, %s21_s29   ;;  %s982_s28 = sphi %s1038_s28, %s1177_s28   ;;  %s978_s27 = sphi %s1036_s27, %s1176_s27   ;;  %s974_s26 = sphi %s1034_s26, %s1175_s26   ;;  %s970_s25 = sphi %s1032_s25, %s1174_s25   ;;  %s966_s24 = sphi %s1030_s24, %s1173_s24  }
   0x6   : > { %s33_s9 = sadd.s32 1, %s982_s28  ;;  %s221_s10 = sadd.s32 1, %s974_s26 }
   0x7   : > { %p35_p0 = scmp.ge.s32.totalorder %s33_s9, 4  ;;  %p231_p1 = scmp.ne.s32.totalorder %s974_s26, %s970_s25 }
   0x8   : > { %p232_p2 = scmp.eq.s32.totalorder %s762_s30, 3  ;;  %p237_p3 = scmp.ne.s32.totalorder %s970_s25, %s966_s24 }
   0x9   : > { %s1179_s9 = smov (%p35_p0, %s33_s9), 0  ;;  %p238_p5 = scmp.eq.s32.totalorder %s763_s8, 3 }
   0xa   : > { %p1070_p4 = por %p232_p2, %p231_p1  ;;  %s216_s12 = ssub.s32 %s982_s28, %s1179_s9 }
   0xb   : > { %p764_p6 = scmp.ge.s32.totalorder %s986_s29, 1  ;;  %p219_p7 = scmp.eq.s32.totalorder %s216_s12, 0 }
   0xc   : > { %p1077_p8 = por %p238_p5, %p237_p3  ;;  %p245_p9 = scmp.lt.s32.totalorder %s986_s29, 5 }
   0xd   : > { %s1083_s14 = scalar_select %p219_p7, %s974_s26, %s221_s10  }
   0xe   : > { %p246_p10 = pnand %p764_p6, %p245_p9  ;;  %p817_p11 = scmp.eq.s32.totalorder %s762_s30, 0 }
   0xf   : > { %s257_s17 = sshll.u32 %s1169_s6, 4  ;;  %s988_s18 = smov [#allocation2]   ;;  %s258_s17 = int_to_ptr.vmem [resolvable:$true] %s257_s17 }
  0x10   : > { %p809_p12 = pneg %p246_p10  ;;  %321 = sbr.rel (%p246_p10) target bundleno = 368 (0x170), region = 48 }
  0x12   : > { %p810_p13 = pnand %p817_p11, %p809_p12 }
  0x14   : > { %812 = dma.vmem_to_smem (!%p810_p13), %s258_s17, 16, %s988_s18, [#allocation4]  }
  0x15   : > { %957 = dma.done.wait (%p817_p11), [#allocation4], 16  }
  0x16   : > { %959 = vsyncadd (%p817_p11), [#allocation4], 4294967280 }
  0x17   : > { %328 = sfence }
  0x18   : > { %p382_p0 = scmp.lt.s32.totalorder %s978_s27, 3  ;;  %v989_v0 = vmov 0   ;;  %vm445_vm0 = vcmask 130048   ;;  %vm519_vm1 = vcmask 261120   ;;  %s380_s15 = sand.u32 1, %s970_s25  }
  0x19   : > { %870 = vset.pattern.permute.xlu0 %v989_v0  ;;  %871 = vset.pattern.permute.xlu1 %v989_v0  ;;  %s616_s18 = scalar_lea.hbm %s1170_s7, %s978_s27  ;;  %s607_s23 = scalar_lea.sflag [#allocation3], %s380_s15 }
  0x1a   : > { %s383_s19 = scalar_select %p382_p0, %s978_s27, 3  ;;  %872 = vset.pattern.permute.xlu2 %v989_v0 }
  0x1b   : > { %s620_s22 = sshll.u32 %s616_s18, 4  ;;  %s621_s22 = int_to_ptr.hbm [resolvable:$true] %s620_s22 }
  0x1c   : > { %s791_s20 = sshll.u32 %s383_s19, 4  ;;  %s1090_s21 = sshll.u32 %s383_s19, 5 }
  0x1d   : > { %s389_s30 = scalar_lea.vmem %s1163_s0, %s791_s20  ;;  %s394_s12 = scalar_lea.vmem %s1164_s1, %s1090_s21 }
  0x1e   : > { %v416_v1 = vld [vmem:[%s389_s30 + $0x8] sm:$0xff]  ;;  %v415_v2 = vld [vmem:[%s389_s30] sm:$0xff]  ;;  %s399_s17 = scalar_lea.vmem %s1165_s2, %s1090_s21  ;;  %v419_v9 = vld [vmem:[%s394_s12 + $0x10] sm:$0xff]  ;;  %s409_s20 = scalar_lea.vmem %s1167_s4, %s1090_s21 }
  0x1f   : > { %797 = vmatpush.msra.mxu3 %v416_v1  ;;  %v418_v3 = vld [vmem:[%s394_s12 + $0x8] sm:$0xff]  ;;  %v424_v4 = vld [vmem:[%s399_s17 + $0x18] sm:$0xff]  ;;  %472 = vmatpush.msra.mxu0 %v416_v1  ;;  %v417_v6 = vld [vmem:[%s394_s12] sm:$0xff]  ;;  %s1115_s30 = scalar_lea.vmem %s1168_s5, %s1090_s21  ;;  %s381_s19 = scalar_lea.vmem [#allocation5], %s380_s15 }
  0x20   : > { %v422_v5 = vld [vmem:[%s399_s17 + $0x8] sm:$0xff]  ;;  %442 = vperm.xlu0 %870, %v424_v4   ;;  %v423_v7 = vld [vmem:[%s399_s17 + $0x10] sm:$0xff]  ;;  %v421_v8 = vld [vmem:[%s399_s17] sm:$0xff] }
  0x21   : > { %432 = vperm.xlu1 %871, %v422_v5   ;;  %798 = vmatpush.msra.mxu3 %v415_v2  ;;  %v497_v10 = vld [vmem:[%s409_s20 + $0x10] sm:$0xff]  ;;  %v498_v11 = vld [vmem:[%s409_s20 + $0x18] sm:$0xff]  ;;  %v566_v13 = vld [vmem:[%s1115_s30 + $0x8] sm:$0xff] }
  0x22   : > { %473 = vmatpush.msra.mxu0 %v415_v2  ;;  %782 = vmatmul.msk.f32.vlgmr.msra.gmra.mxu3 %vm445_vm0, %v418_v3  ;;  %v420_v12 = vld [vmem:[%s394_s12 + $0x18] sm:$0xff]  ;;  %v567_v14 = vld [vmem:[%s1115_s30 + $0x10] sm:$0xff]  ;;  %v495_v18 = vld [vmem:[%s409_s20] sm:$0xff]  ;;  %s404_s12 = scalar_lea.vmem %s1166_s3, %s1090_s21  ;;  %s602_s21 = sld [smem:[#allocation2 + %s978_s27]] }
  0x23   : > { %781 = vmatmul.msk.f32.vlgmr.msra.gmra.mxu0 %vm445_vm0, %v417_v6  ;;  %501 = vperm.xlu2 %872, %v495_v18   ;;  %v496_v20 = vld [vmem:[%s409_s20 + $0x8] sm:$0xff]  ;;  %v565_v29 = vld [vmem:[%s1115_s30] sm:$0xff]  ;;  %v493_v34 = vld [vmem:[%s404_s12 + $0x10] sm:$0xff]  ;;  %s618_s20 = sshll.u32 %s381_s19, 4  ;;  %s619_s20 = int_to_ptr.vmem [resolvable:$true] %s618_s20 }
  0x24   : > { %v491_v33 = vld [vmem:[%s404_s12] sm:$0xff]  ;;  %v568_v36 = vld [vmem:[%s1115_s30 + $0x18] sm:$0xff]  ;;  %v492_v37 = vld [vmem:[%s404_s12 + $0x8] sm:$0xff]  ;;  %s918_s30 = sshra.s32 %s621_s22, 4  ;;  %s919_s30 = int_to_ptr.hbm [resolvable:$true] %s918_s30 }
  0x25   : > { %v494_v38 = vld [vmem:[%s404_s12 + $0x18] sm:$0xff]  ;;  %s920_s8 = scalar_lea.hbm %s919_s30, 1  ;;  %s924_s12 = scalar_lea.hbm %s1170_s7, 4 }
  0x26   : > { %p921_p1 = scmp.ne.s32.totalorder %s919_s30, %s920_s8  ;;  %p925_p5 = scmp.lt.s32.totalorder %s919_s30, %s1170_s7 }
  0x27   : > { %p926_p6 = scmp.lt.s32.totalorder %s924_s12, %s920_s8 }
  0x28   : > { %437 = vperm.xlu0 %870, %v423_v7   ;;  %v603_v7 = vstv %s602_s21  ;;  %p922_p2 = pnand %p921_p1, %p1070_p4 }
  0x29   : > { %427 = vperm.xlu1 %871, %v421_v8   ;;  %p927_p7 = por %p926_p6, %p925_p5 }
  0x2a   : > { %783 = vmatmul.msk.f32.gmra.mxu3 %vm445_vm0, %v419_v9  ;;  %p923_p3 = pneg %p922_p2 }
  0x2b   : > { %506 = vperm.xlu2 %872, %v496_v20  }
  0x2c   : > { %p928_p9 = pnand %p927_p7, %p923_p3 }
  0x30   : > { %511 = vperm.xlu0 %870, %v497_v10  }
  0x31   : > { %516 = vperm.xlu1 %871, %v498_v11  }
  0x32   : > { %784 = vmatmul.msk.f32.gmra.mxu3 %vm445_vm0, %v420_v12 }
  0x33   : > { %571 = vperm.xlu2 %872, %v565_v29  }
  0x38   : > { %576 = vperm.xlu0 %870, %v566_v13  }
  0x39   : > { %581 = vperm.xlu1 %871, %v567_v14  }
  0x3b   : > { %586 = vperm.xlu2 %872, %v568_v36  }
  0x7d   : > { %v502_v39 = vpop.permute.xlu2 %501 }
  0x85   : > { %v507_v41 = vpop.permute.xlu2 %506 }
  0x8d   : > { %v572_v49 = vpop.permute.xlu2 %571 }
  0x92   : > { %v443_v16 = vpop.permute.xlu0 %442 }
  0x93   : > { %v433_v19 = vpop.permute.xlu1 %432 }
  0x95   : > { %v587_v62 = vpop.permute.xlu2 %586 }
  0x9a   : > { %v438_v21 = vpop.permute.xlu0 %437 }
  0x9b   : > { %v428_v27 = vpop.permute.xlu1 %427 }
  0xa0   : > { %v475_v25 = vpop.f32.mrf.mxu0 }
  0xa1   : > { %v476_v28 = vadd.f32 %v475_v25, %v428_v27 }
  0xa2   : > { %v512_v44 = vpop.permute.xlu0 %511 }
  0xa3   : > { %v517_v48 = vpop.permute.xlu1 %516 }
  0xa5   : > { %v478_v15 = vpop.f32.mrf.mxu3 }
  0xa6   : > { %v479_v26 = vadd.f32 %v478_v15, %v433_v19 }
  0xaa   : > { %v577_v54 = vpop.permute.xlu0 %576 }
  0xab   : > { %v582_v59 = vpop.permute.xlu1 %581 }
  0xad   : > { %v481_v17 = vpop.f32.mrf.mxu3 }
  0xae   : > { %v482_v23 = vadd.f32 %v481_v17, %v438_v21 }
  0xb5   : > { %v484_v22 = vpop.f32.mrf.mxu3 }
  0xb6   : > { %v485_v24 = vadd.f32 %v484_v22, %v443_v16 }
  0xb8   : > { %873 = vtanh.f32 %v485_v24 }
  0xb9   : > { %875 = vtanh.f32 %v482_v23 }
  0xba   : > { %877 = vtanh.f32 %v479_v26 }
  0xbb   : > { %879 = vtanh.f32 %v476_v28 }
  0xbe   : > { %v874_v30 = vpop.eup %873 }
  0xbf   : > { %544 = vmatpush.msra.mxu1 %v874_v30  ;;  %799 = vmatpush.msra.mxu2 %v874_v30  ;;  %v876_v31 = vpop.eup %875 }
  0xc0   : > { %v878_v32 = vpop.eup %877 }
  0xc1   : > { %545 = vmatpush.msra.mxu1 %v876_v31  ;;  %800 = vmatpush.msra.mxu2 %v876_v31  ;;  %v880_v35 = vpop.eup %879 }
  0xc3   : > { %546 = vmatpush.msra.mxu1 %v878_v32  ;;  %801 = vmatpush.msra.mxu2 %v878_v32 }
  0xc5   : > { %547 = vmatpush.msra.mxu1 %v880_v35  ;;  %802 = vmatpush.msra.mxu2 %v880_v35 }
  0xc6   : > { %785 = vmatmul.msk.f32.vlgmr.msra.gmra.mxu1 %vm519_vm1, %v491_v33  ;;  %787 = vmatmul.msk.f32.vlgmr.msra.gmra.mxu2 %vm519_vm1, %v493_v34 }
  0xce   : > { %786 = vmatmul.msk.f32.gmra.mxu1 %vm519_vm1, %v492_v37  ;;  %788 = vmatmul.msk.f32.gmra.mxu2 %vm519_vm1, %v494_v38 }
 0x143   : > { %v549_v40 = vpop.f32.mrf.mxu1 }
 0x144   : > { %v550_v42 = vadd.f32 %v549_v40, %v502_v39 }
 0x146   : > { %881 = vtanh.f32 %v550_v42 }
 0x149   : > { %v555_v43 = vpop.f32.mrf.mxu2 }
 0x14a   : > { %v556_v46 = vadd.f32 %v555_v43, %v512_v44 }
 0x14b   : > { %v552_v45 = vpop.f32.mrf.mxu1 }
 0x14c   : > { %v553_v47 = vadd.f32 %v552_v45, %v507_v41  ;;  %v882_v51 = vpop.eup %881 }
 0x14d   : > { %v589_v55 = vmul.f32 %v882_v51, %v572_v49 }
 0x14e   : > { %883 = vtanh.f32 %v553_v47 }
 0x14f   : > { %885 = vtanh.f32 %v556_v46 }
 0x151   : > { %v558_v50 = vpop.f32.mrf.mxu2 }
 0x152   : > { %v559_v52 = vadd.f32 %v558_v50, %v517_v48 }
 0x154   : > { %v884_v53 = vpop.eup %883  ;;  %887 = vtanh.f32 %v559_v52 }
 0x155   : > { %v590_v56 = vmul.f32 %v884_v53, %v577_v54  ;;  %v886_v57 = vpop.eup %885 }
 0x156   : > { %v591_v60 = vmul.f32 %v886_v57, %v582_v59 }
 0x157   : > { %v593_v58 = vadd.f32 %v590_v56, %v589_v55 }
 0x159   : > { %v594_v0 = vadd.f32 %v593_v58, %v591_v60 }
 0x15a   : > { %v888_v61 = vpop.eup %887 }
 0x15b   : > { %v592_v63 = vmul.f32 %v888_v61, %v587_v62 }
 0x15d   : > { %v595_v1 = vadd.f32 %v594_v0, %v592_v63 }
 0x15f   : > { %v596_v2 = vrot.slane %v595_v1, 4 }
 0x161   : > { %v597_v3 = vadd.f32 %v596_v2, %v595_v1 }
 0x163   : > { %v598_v4 = vrot.slane %v597_v3, 2 }
 0x165   : > { %v599_v5 = vadd.f32 %v598_v4, %v597_v3 }
 0x167   : > { %v600_v6 = vrot.slane %v599_v5, 1 }
 0x169   : > { %v601_v8 = vadd.f32 %v600_v6, %v599_v5 }
 0x16b   : > { %v604_v9 = vadd.f32 %v603_v7, %v601_v8 }
 0x16d   : > { %605 = vst [vmem:[%s381_s19] sm:$0x1] %v604_v9 }
 0x16e   : > { %931 = shalt.err (!%p928_p9)
}
 0x16f   : > { %807 = dma.vmem_to_hbm [thread:$0]  (%p1070_p4), %s619_s20, 16, %s621_s22, %s607_s23  }
 0x170 PF: > { %p819_p10 = scmp.ge.s32.totalorder %s986_s29, 2  ;;  %s632_s15 = sand.u32 1, %s966_s24  }
 0x171   : > { %s633_s17 = scalar_lea.sflag [#allocation3], %s632_s15 }
 0x172   : > { %p814_p11 = pnand %p819_p10, %p1077_p8 }
 0x174   : > { %p815_p12 = pneg %p814_p11 }
 0x176   : > { %961 = dma.done.wait (%p815_p12), %s633_s17, 16  }
 0x177   : > { %963 = vsyncadd (%p815_p12), %s633_s17, 4294967280  ;;  %s21_s29 = sadd.s32 1, %s986_s29   ;;  %s1173_s24 = smov %s970_s25 }
 0x178   : > { %p18_p13 = scmp.ge.s32.totalorder %s21_s29, 6   ;;  %s1174_s25 = smov %s974_s26 }
 0x179   : > { %s1175_s26 = smov %s1083_s14  ;;  %s1176_s27 = smov %s982_s28 }
 0x17a   : > { %s1177_s28 = smov %s1179_s9  ;;  %20 = sbr.rel (!%p18_p13) target bundleno = 5 (0x5), region = 103 }
 0x17f   :  { %638 = vsyncpa [#allocation3], 1 }
 0x180   :  { %640 = vsyncpa [#allocation3 + $0x1], 1 }
 0x181   :  { %641 = vsyncpa [#allocation4], 1 }
 0x182   :  { %643 = vsyncpa [#allocation4 + $0x1], 1 }

</bundles_post_ra>
